<compile_context>
chip_gen: v7x
topology: tpu7x:2x2x1
jax: 0.10.0
libtpu: 0.0.40
codegen_flags: <defaults>
</compile_context>

<pallas_src>
import functools

import jax
import jax.numpy as jnp
from jax import lax
from jax.experimental import pallas as pl
from jax.experimental.pallas import tpu as pltpu

F_PAD = 128                       # lane-dense width for all feature/class dims
_VMEM_LIMIT = 32 * 1024 * 1024    # explicit scoped-VMEM budget (safe on v5e/v6e/v7x)
_FUSED_MAX_NODES = 1024           # padded-N threshold for the fully fused kernel


# --------------------------- fused whole-net kernel ---------------------------

def _fused_kernel(a_ref, x_ref, w1_ref, b1_ref, w2_ref, b2_ref, w3_ref, b3_ref,
                  p_ref, wl_ref, bl_ref, out_ref, *, num_classes):
    """Entire forward pass with A_hat / weights / intermediates VMEM-resident."""
    a = a_ref[...]                                           # [N_pad, N_pad] bf16

    def gcn(h_bf16, w_ref, b_ref):
        # (A_hat @ H) @ W + b , relu -- bf16 MXU operands, f32 accumulation.
        agg = jnp.dot(a, h_bf16, preferred_element_type=jnp.float32)
        h = jnp.dot(agg.astype(jnp.bfloat16), w_ref[...],
                    preferred_element_type=jnp.float32) + b_ref[...]
        return jnp.maximum(h, 0.0).astype(jnp.bfloat16)

    h = gcn(x_ref[...], w1_ref, b1_ref)                      # GCNConv(13 -> 16)
    h = gcn(h, w2_ref, b2_ref)                               # GCNConv(16 -> 64)
    h = gcn(h, w3_ref, b3_ref)                               # GCNConv(64 -> 128)

    # global_mean_pool via pooling matrix P [G_pad, N_pad].
    pooled = jnp.dot(p_ref[...], h, preferred_element_type=jnp.float32)
    # Dropout(p=0.025) is identity at inference.
    logits = jnp.dot(pooled.astype(jnp.bfloat16), wl_ref[...],
                     preferred_element_type=jnp.float32) + bl_ref[...]
    # Mask padded class lanes so they contribute nothing to log_softmax.
    col = lax.broadcasted_iota(jnp.int32, logits.shape, 1)
    logits = jnp.where(col < num_classes, logits, -1e30)
    m = jnp.max(logits, axis=1, keepdims=True)
    z = logits - m
    lse = jnp.log(jnp.sum(jnp.exp(z), axis=1, keepdims=True))
    out_ref[...] = z - lse


def _fused_forward(a_hat_p, x_p, weights, pool_p, *, num_classes):
    (w1p, b1p), (w2p, b2p), (w3p, b3p), (wlp, blp) = weights
    n_pad = a_hat_p.shape[0]
    g_pad = pool_p.shape[0]

    def full(shape):
        return pl.BlockSpec(shape, lambda i: (0, 0))

    return pl.pallas_call(
        functools.partial(_fused_kernel, num_classes=num_classes),
        out_shape=jax.ShapeDtypeStruct((g_pad, F_PAD), jnp.float32),
        grid=(1,),
        in_specs=[
            full((n_pad, n_pad)),                 # A_hat
            full((n_pad, F_PAD)),                 # X
            full((F_PAD, F_PAD)), full((1, F_PAD)),   # W1, b1
            full((F_PAD, F_PAD)), full((1, F_PAD)),   # W2, b2
            full((F_PAD, F_PAD)), full((1, F_PAD)),   # W3, b3
            full((g_pad, n_pad)),                 # pooling matrix
            full((F_PAD, F_PAD)), full((1, F_PAD)),   # Wl, bl
        ],
        out_specs=full((g_pad, F_PAD)),
        compiler_params=pltpu.CompilerParams(
            dimension_semantics=("arbitrary",),
            vmem_limit_bytes=_VMEM_LIMIT),
    )(a_hat_p, x_p, w1p, b1p, w2p, b2p, w3p, b3p, pool_p, wlp, blp)


# ----------------------- tiled GCN layer kernel (large N) ---------------------

def _gcn_layer_kernel(a_ref, x_ref, w_ref, b_ref, out_ref):
    """One node-row tile of  relu( (A_hat @ X) @ W + b )."""
    agg = jnp.dot(a_ref[...], x_ref[...], preferred_element_type=jnp.float32)
    h = jnp.dot(agg.astype(jnp.bfloat16), w_ref[...],
                preferred_element_type=jnp.float32)
    h = h + b_ref[...]
    out_ref[...] = jnp.maximum(h, 0.0).astype(out_ref.dtype)


def _gcn_layer(a_hat, x, w, b, *, tile_n):
    n_pad = a_hat.shape[0]
    grid = (n_pad // tile_n,)
    return pl.pallas_call(
        _gcn_layer_kernel,
        out_shape=jax.ShapeDtypeStruct((n_pad, F_PAD), jnp.bfloat16),
        grid=grid,
        in_specs=[
            pl.BlockSpec((tile_n, n_pad), lambda i: (i, 0)),   # A_hat row panel
            pl.BlockSpec((n_pad, F_PAD), lambda i: (0, 0)),    # full X (resident)
            pl.BlockSpec((F_PAD, F_PAD), lambda i: (0, 0)),    # W (resident)
            pl.BlockSpec((1, F_PAD), lambda i: (0, 0)),        # bias
        ],
        out_specs=pl.BlockSpec((tile_n, F_PAD), lambda i: (i, 0)),
        compiler_params=pltpu.CompilerParams(
            dimension_semantics=("parallel",),
            vmem_limit_bytes=_VMEM_LIMIT),
    )(a_hat, x, w, b)


# ------------- pooling + linear head + log_softmax kernel (large N) -----------

def _head_kernel(p_ref, h_ref, wl_ref, bl_ref, out_ref, acc_ref, *, num_classes):
    k = pl.program_id(0)

    @pl.when(k == 0)
    def _():
        acc_ref[...] = jnp.zeros_like(acc_ref)

    # Accumulate mean-pool contribution of this node tile: P[:, tile] @ H[tile, :]
    acc_ref[...] += jnp.dot(p_ref[...], h_ref[...],
                            preferred_element_type=jnp.float32)

    @pl.when(k == pl.num_programs(0) - 1)
    def _():
        pooled = acc_ref[...]                                    # [G_pad, 128] f32
        logits = jnp.dot(pooled.astype(jnp.bfloat16), wl_ref[...],
                         preferred_element_type=jnp.float32) + bl_ref[...]
        col = lax.broadcasted_iota(jnp.int32, logits.shape, 1)
        logits = jnp.where(col < num_classes, logits, -1e30)
        m = jnp.max(logits, axis=1, keepdims=True)
        z = logits - m
        lse = jnp.log(jnp.sum(jnp.exp(z), axis=1, keepdims=True))
        out_ref[...] = z - lse


def _pool_head(pool, h, wl, bl, *, tile_n, num_classes):
    g_pad, n_pad = pool.shape
    grid = (n_pad // tile_n,)
    return pl.pallas_call(
        functools.partial(_head_kernel, num_classes=num_classes),
        out_shape=jax.ShapeDtypeStruct((g_pad, F_PAD), jnp.float32),
        grid=grid,
        in_specs=[
            pl.BlockSpec((g_pad, tile_n), lambda k: (0, k)),   # pooling panel
            pl.BlockSpec((tile_n, F_PAD), lambda k: (k, 0)),   # H node tile
            pl.BlockSpec((F_PAD, F_PAD), lambda k: (0, 0)),    # linear weight
            pl.BlockSpec((1, F_PAD), lambda k: (0, 0)),        # linear bias
        ],
        out_specs=pl.BlockSpec((g_pad, F_PAD), lambda k: (0, 0)),
        scratch_shapes=[pltpu.VMEM((g_pad, F_PAD), jnp.float32)],
        compiler_params=pltpu.CompilerParams(
            dimension_semantics=("arbitrary",),
            vmem_limit_bytes=_VMEM_LIMIT),
    )(pool, h, wl, bl)


# --------------------------------- wrapper ------------------------------------

def _pad2d(a, rows, cols, dtype):
    out = jnp.zeros((rows, cols), dtype)
    return out.at[:a.shape[0], :a.shape[1]].set(a.astype(dtype))


@functools.partial(jax.jit, static_argnames=("num_graphs",))
def graphnet_forward(x, edge_index, batch, params, *, num_graphs):
    """Glue: dense normalized adjacency + pooling matrix, then Pallas kernels."""
    n = x.shape[0]
    tile_n = 128 if n <= _FUSED_MAX_NODES else 256
    n_pad = ((n + tile_n - 1) // tile_n) * tile_n
    g_pad = ((num_graphs + 7) // 8) * 8

    src, dst = edge_index[0], edge_index[1]
    # A[dst, src] = 1 (messages flow src -> dst), plus self-loops, sym-normalized.
    adj = jnp.zeros((n, n), jnp.float32).at[dst, src].set(1.0)
    adj = adj + jnp.eye(n, dtype=jnp.float32)
    deg = jnp.sum(adj, axis=1)
    d_inv_sqrt = jnp.where(deg > 0, lax.rsqrt(deg), 0.0)
    a_hat = d_inv_sqrt[:, None] * adj * d_inv_sqrt[None, :]
    # TODO(synk): for very large sparse graphs replace the dense A_hat (O(N^2))
    # with an edge-list/CSR aggregation driven by PrefetchScalarGridSpec.
    a_hat_p = _pad2d(a_hat, n_pad, n_pad, jnp.bfloat16)

    x_p = _pad2d(x, n_pad, F_PAD, jnp.bfloat16)

    # Mean-pooling matrix P: [G_pad, N_pad], padded rows/cols are zero.
    onehot = (batch[None, :] == jnp.arange(num_graphs)[:, None]).astype(jnp.float32)
    counts = jnp.maximum(jnp.sum(onehot, axis=1, keepdims=True), 1.0)
    pool_p = _pad2d(onehot / counts, g_pad, n_pad, jnp.bfloat16)

    (w1, b1), (w2, b2), (w3, b3), (wl, bl) = params
    num_classes = wl.shape[1]
    w1p = _pad2d(w1, F_PAD, F_PAD, jnp.bfloat16)
    w2p = _pad2d(w2, F_PAD, F_PAD, jnp.bfloat16)
    w3p = _pad2d(w3, F_PAD, F_PAD, jnp.bfloat16)
    wlp = _pad2d(wl, F_PAD, F_PAD, jnp.bfloat16)
    b1p = _pad2d(b1, 1, F_PAD, jnp.float32)
    b2p = _pad2d(b2, 1, F_PAD, jnp.float32)
    b3p = _pad2d(b3, 1, F_PAD, jnp.float32)
    blp = _pad2d(bl, 1, F_PAD, jnp.float32)

    if n_pad <= _FUSED_MAX_NODES:
        weights = ((w1p, b1p), (w2p, b2p), (w3p, b3p), (wlp, blp))
        out = _fused_forward(a_hat_p, x_p, weights, pool_p,
                             num_classes=num_classes)
    else:
        h = _gcn_layer(a_hat_p, x_p, w1p, b1p, tile_n=tile_n)   # GCNConv(13 -> 16)
        h = _gcn_layer(a_hat_p, h, w2p, b2p, tile_n=tile_n)     # GCNConv(16 -> 64)
        h = _gcn_layer(a_hat_p, h, w3p, b3p, tile_n=tile_n)     # GCNConv(64 -> 128)
        out = _pool_head(pool_p, h, wlp, blp, tile_n=tile_n,
                         num_classes=num_classes)

    return out[:num_graphs, :num_classes]


# --------------------------- pure-JAX reference --------------------------------

def graphnet_reference(x, edge_index, batch, params, num_graphs):
    n = x.shape[0]
    src, dst = edge_index[0], edge_index[1]
    adj = jnp.zeros((n, n), jnp.float32).at[dst, src].set(1.0)
    adj = adj + jnp.eye(n, dtype=jnp.float32)
    deg = jnp.sum(adj, axis=1)
    dis = jnp.where(deg > 0, lax.rsqrt(deg), 0.0)
    a_hat = dis[:, None] * adj * dis[None, :]

    (w1, b1), (w2, b2), (w3, b3), (wl, bl) = params
    h = jnp.maximum(a_hat @ x @ w1 + b1, 0.0)
    h = jnp.maximum(a_hat @ h @ w2 + b2, 0.0)
    h = jnp.maximum(a_hat @ h @ w3 + b3, 0.0)

    onehot = (batch[None, :] == jnp.arange(num_graphs)[:, None]).astype(jnp.float32)
    counts = jnp.maximum(jnp.sum(onehot, axis=1, keepdims=True), 1.0)
    pooled = (onehot / counts) @ h

    logits = pooled @ wl + bl
    return jax.nn.log_softmax(logits, axis=1)


# ----------------------------- parameter init ---------------------------------

def glorot(key, shape):
    fan_in, fan_out = shape
    limit = (6.0 / (fan_in + fan_out)) ** 0.5
    return jax.random.uniform(key, shape, jnp.float32, -limit, limit)


def init_params(key, num_classes):
    ks = jax.random.split(key, 4)
    w1 = glorot(ks[0], (13, 16));   b1 = jnp.zeros((1, 16), jnp.float32)
    w2 = glorot(ks[1], (16, 64));   b2 = jnp.zeros((1, 64), jnp.float32)
    w3 = glorot(ks[2], (64, 128));  b3 = jnp.zeros((1, 128), jnp.float32)
    wl = glorot(ks[3], (128, num_classes))
    bl = jnp.zeros((1, num_classes), jnp.float32)
    return ((w1, b1), (w2, b2), (w3, b3), (wl, bl))


# ------------------------------------ main -------------------------------------

if __name__ == "__main__":
    num_classes = 4
    num_nodes = 8
    num_graphs = 2

    key = jax.random.PRNGKey(0)
    k_x, k_p = jax.random.split(key)

    # Node features [N, 13]
    x = jax.random.normal(k_x, (num_nodes, 13), jnp.float32)

    # Two small graphs: nodes 0-3 (graph 0) and 4-7 (graph 1), undirected.
    edges = [(0, 1), (1, 2), (2, 3), (0, 2),
             (4, 5), (5, 6), (6, 7), (4, 7)]
    src = [s for s, d in edges] + [d for s, d in edges]
    dst = [d for s, d in edges] + [s for s, d in edges]
    edge_index = jnp.array([src, dst], dtype=jnp.int32)       # [2, 2E]
    batch = jnp.array([0, 0, 0, 0, 1, 1, 1, 1], dtype=jnp.int32)

    params = init_params(k_p, num_classes)

    out = graphnet_forward(x, edge_index, batch, params, num_graphs=num_graphs)
    out = jax.block_until_ready(out)

    assert out.shape == (num_graphs, num_classes)
    # log_softmax rows must sum (in prob space) to ~1
    assert jnp.allclose(jnp.sum(jnp.exp(out), axis=1), 1.0, atol=1e-4)
    # bf16-tolerance agreement with a pure f32 JAX reference.
    ref = graphnet_reference(x, edge_index, batch, params, num_graphs)
    assert jnp.allclose(out, ref, atol=0.15), (out, ref)

    print("KERNEL_OK")
</pallas_src>

<mosaic_0001>
module attributes {stable_mosaic.version = 11 : i64} {
  func.func @_fused_kernel(%arg0: i32, %arg1: memref<128x128xbf16, #tpu.memory_space<vmem>>, %arg2: memref<128x128xbf16, #tpu.memory_space<vmem>>, %arg3: memref<128x128xbf16, #tpu.memory_space<vmem>>, %arg4: memref<1x128xf32, #tpu.memory_space<vmem>>, %arg5: memref<128x128xbf16, #tpu.memory_space<vmem>>, %arg6: memref<1x128xf32, #tpu.memory_space<vmem>>, %arg7: memref<128x128xbf16, #tpu.memory_space<vmem>>, %arg8: memref<1x128xf32, #tpu.memory_space<vmem>>, %arg9: memref<8x128xbf16, #tpu.memory_space<vmem>>, %arg10: memref<128x128xbf16, #tpu.memory_space<vmem>>, %arg11: memref<1x128xf32, #tpu.memory_space<vmem>>, %arg12: memref<8x128xf32, #tpu.memory_space<vmem>>) attributes {dimension_semantics = [#tpu.dimension_semantics<arbitrary>], iteration_bounds = array<i64: 1>, scalar_prefetch = 0 : i64, scratch_operands = 0 : i64, tpu.core_type = #tpu.core_type<tc>, window_params = [{pipeline_mode = #tpu.pipeline_mode<synchronous>, transform_indices = @transform_0, window_bounds = array<i64: 128, 128>}, {pipeline_mode = #tpu.pipeline_mode<synchronous>, transform_indices = @transform_1, window_bounds = array<i64: 128, 128>}, {pipeline_mode = #tpu.pipeline_mode<synchronous>, transform_indices = @transform_2, window_bounds = array<i64: 128, 128>}, {pipeline_mode = #tpu.pipeline_mode<synchronous>, transform_indices = @transform_3, window_bounds = array<i64: 1, 128>}, {pipeline_mode = #tpu.pipeline_mode<synchronous>, transform_indices = @transform_4, window_bounds = array<i64: 128, 128>}, {pipeline_mode = #tpu.pipeline_mode<synchronous>, transform_indices = @transform_5, window_bounds = array<i64: 1, 128>}, {pipeline_mode = #tpu.pipeline_mode<synchronous>, transform_indices = @transform_6, window_bounds = array<i64: 128, 128>}, {pipeline_mode = #tpu.pipeline_mode<synchronous>, transform_indices = @transform_7, window_bounds = array<i64: 1, 128>}, {pipeline_mode = #tpu.pipeline_mode<synchronous>, transform_indices = @transform_8, window_bounds = array<i64: 8, 128>}, {pipeline_mode = #tpu.pipeline_mode<synchronous>, transform_indices = @transform_9, window_bounds = array<i64: 128, 128>}, {pipeline_mode = #tpu.pipeline_mode<synchronous>, transform_indices = @transform_10, window_bounds = array<i64: 1, 128>}, {pipeline_mode = #tpu.pipeline_mode<synchronous>, transform_indices = @transform_11, window_bounds = array<i64: 8, 128>}]} {
    %c0 = arith.constant 0 : index
    %c0_0 = arith.constant 0 : index
    %0 = vector.load %arg1[%c0, %c0_0] : memref<128x128xbf16, #tpu.memory_space<vmem>>, vector<128x128xbf16>
    %c0_1 = arith.constant 0 : index
    %c0_2 = arith.constant 0 : index
    %1 = vector.load %arg2[%c0_1, %c0_2] : memref<128x128xbf16, #tpu.memory_space<vmem>>, vector<128x128xbf16>
    %cst = arith.constant dense<0.000000e+00> : vector<128x128xf32>
    %2 = tpu.matmul %0, %1, %cst {dimension_numbers = #tpu.dot_dimension_numbers<[1], [0], [0], [1], [0, 0, 1, 1], [], []>} : vector<128x128xbf16>, vector<128x128xbf16>, vector<128x128xf32> -> vector<128x128xf32>
    %3 = arith.truncf %2 : vector<128x128xf32> to vector<128x128xbf16>
    %c0_3 = arith.constant 0 : index
    %c0_4 = arith.constant 0 : index
    %4 = vector.load %arg3[%c0_3, %c0_4] : memref<128x128xbf16, #tpu.memory_space<vmem>>, vector<128x128xbf16>
    %cst_5 = arith.constant dense<0.000000e+00> : vector<128x128xf32>
    %5 = tpu.matmul %3, %4, %cst_5 {dimension_numbers = #tpu.dot_dimension_numbers<[1], [0], [0], [1], [0, 0, 1, 1], [], []>} : vector<128x128xbf16>, vector<128x128xbf16>, vector<128x128xf32> -> vector<128x128xf32>
    %c0_6 = arith.constant 0 : index
    %c0_7 = arith.constant 0 : index
    %6 = vector.load %arg4[%c0_6, %c0_7] : memref<1x128xf32, #tpu.memory_space<vmem>>, vector<1x128xf32>
    %7 = vector.broadcast %6 : vector<1x128xf32> to vector<128x128xf32>
    %8 = arith.addf %5, %7 : vector<128x128xf32>
    %cst_8 = arith.constant 0.000000e+00 : f32
    %9 = vector.broadcast %cst_8 : f32 to vector<128x128xf32>
    %10 = arith.maximumf %8, %9 : vector<128x128xf32>
    %11 = arith.truncf %10 : vector<128x128xf32> to vector<128x128xbf16>
    %cst_9 = arith.constant dense<0.000000e+00> : vector<128x128xf32>
    %12 = tpu.matmul %0, %11, %cst_9 {dimension_numbers = #tpu.dot_dimension_numbers<[1], [0], [0], [1], [0, 0, 1, 1], [], []>} : vector<128x128xbf16>, vector<128x128xbf16>, vector<128x128xf32> -> vector<128x128xf32>
    %13 = arith.truncf %12 : vector<128x128xf32> to vector<128x128xbf16>
    %c0_10 = arith.constant 0 : index
    %c0_11 = arith.constant 0 : index
    %14 = vector.load %arg5[%c0_10, %c0_11] : memref<128x128xbf16, #tpu.memory_space<vmem>>, vector<128x128xbf16>
    %cst_12 = arith.constant dense<0.000000e+00> : vector<128x128xf32>
    %15 = tpu.matmul %13, %14, %cst_12 {dimension_numbers = #tpu.dot_dimension_numbers<[1], [0], [0], [1], [0, 0, 1, 1], [], []>} : vector<128x128xbf16>, vector<128x128xbf16>, vector<128x128xf32> -> vector<128x128xf32>
    %c0_13 = arith.constant 0 : index
    %c0_14 = arith.constant 0 : index
    %16 = vector.load %arg6[%c0_13, %c0_14] : memref<1x128xf32, #tpu.memory_space<vmem>>, vector<1x128xf32>
    %17 = vector.broadcast %16 : vector<1x128xf32> to vector<128x128xf32>
    %18 = arith.addf %15, %17 : vector<128x128xf32>
    %cst_15 = arith.constant 0.000000e+00 : f32
    %19 = vector.broadcast %cst_15 : f32 to vector<128x128xf32>
    %20 = arith.maximumf %18, %19 : vector<128x128xf32>
    %21 = arith.truncf %20 : vector<128x128xf32> to vector<128x128xbf16>
    %cst_16 = arith.constant dense<0.000000e+00> : vector<128x128xf32>
    %22 = tpu.matmul %0, %21, %cst_16 {dimension_numbers = #tpu.dot_dimension_numbers<[1], [0], [0], [1], [0, 0, 1, 1], [], []>} : vector<128x128xbf16>, vector<128x128xbf16>, vector<128x128xf32> -> vector<128x128xf32>
    %23 = arith.truncf %22 : vector<128x128xf32> to vector<128x128xbf16>
    %c0_17 = arith.constant 0 : index
    %c0_18 = arith.constant 0 : index
    %24 = vector.load %arg7[%c0_17, %c0_18] : memref<128x128xbf16, #tpu.memory_space<vmem>>, vector<128x128xbf16>
    %cst_19 = arith.constant dense<0.000000e+00> : vector<128x128xf32>
    %25 = tpu.matmul %23, %24, %cst_19 {dimension_numbers = #tpu.dot_dimension_numbers<[1], [0], [0], [1], [0, 0, 1, 1], [], []>} : vector<128x128xbf16>, vector<128x128xbf16>, vector<128x128xf32> -> vector<128x128xf32>
    %c0_20 = arith.constant 0 : index
    %c0_21 = arith.constant 0 : index
    %26 = vector.load %arg8[%c0_20, %c0_21] : memref<1x128xf32, #tpu.memory_space<vmem>>, vector<1x128xf32>
    %27 = vector.broadcast %26 : vector<1x128xf32> to vector<128x128xf32>
    %28 = arith.addf %25, %27 : vector<128x128xf32>
    %cst_22 = arith.constant 0.000000e+00 : f32
    %29 = vector.broadcast %cst_22 : f32 to vector<128x128xf32>
    %30 = arith.maximumf %28, %29 : vector<128x128xf32>
    %31 = arith.truncf %30 : vector<128x128xf32> to vector<128x128xbf16>
    %c0_23 = arith.constant 0 : index
    %c0_24 = arith.constant 0 : index
    %32 = vector.load %arg9[%c0_23, %c0_24] : memref<8x128xbf16, #tpu.memory_space<vmem>>, vector<8x128xbf16>
    %cst_25 = arith.constant dense<0.000000e+00> : vector<8x128xf32>
    %33 = tpu.matmul %32, %31, %cst_25 {dimension_numbers = #tpu.dot_dimension_numbers<[1], [0], [0], [1], [0, 0, 1, 1], [], []>} : vector<8x128xbf16>, vector<128x128xbf16>, vector<8x128xf32> -> vector<8x128xf32>
    %34 = arith.truncf %33 : vector<8x128xf32> to vector<8x128xbf16>
    %c0_26 = arith.constant 0 : index
    %c0_27 = arith.constant 0 : index
    %35 = vector.load %arg10[%c0_26, %c0_27] : memref<128x128xbf16, #tpu.memory_space<vmem>>, vector<128x128xbf16>
    %cst_28 = arith.constant dense<0.000000e+00> : vector<8x128xf32>
    %36 = tpu.matmul %34, %35, %cst_28 {dimension_numbers = #tpu.dot_dimension_numbers<[1], [0], [0], [1], [0, 0, 1, 1], [], []>} : vector<8x128xbf16>, vector<128x128xbf16>, vector<8x128xf32> -> vector<8x128xf32>
    %c0_29 = arith.constant 0 : index
    %c0_30 = arith.constant 0 : index
    %37 = vector.load %arg11[%c0_29, %c0_30] : memref<1x128xf32, #tpu.memory_space<vmem>>, vector<1x128xf32>
    %38 = vector.broadcast %37 : vector<1x128xf32> to vector<8x128xf32>
    %39 = arith.addf %36, %38 : vector<8x128xf32>
    %40 = tpu.iota {dimensions = array<i32: 1>} : vector<8x128xi32>
    %c4_i32 = arith.constant 4 : i32
    %41 = vector.broadcast %c4_i32 : i32 to vector<8x128xi32>
    %42 = arith.cmpi slt, %40, %41 : vector<8x128xi32>
    %cst_31 = arith.constant -1.000000e+30 : f32
    %43 = vector.broadcast %cst_31 : f32 to vector<8x128xf32>
    %44 = arith.select %42, %39, %43 : vector<8x128xi1>, vector<8x128xf32>
    %cst_32 = arith.constant dense<0xFF800000> : vector<8xf32>
    %45 = vector.multi_reduction <maximumf>, %44, %cst_32 [1] : vector<8x128xf32> to vector<8xf32>
    %46 = vector.shape_cast %45 : vector<8xf32> to vector<8x1xf32>
    %47 = vector.broadcast %46 : vector<8x1xf32> to vector<8x128xf32>
    %48 = arith.subf %44, %47 : vector<8x128xf32>
    %49 = math.exp %48 : vector<8x128xf32>
    %cst_33 = arith.constant dense<0.000000e+00> : vector<8xf32>
    %50 = vector.multi_reduction <add>, %49, %cst_33 [1] : vector<8x128xf32> to vector<8xf32>
    %51 = vector.shape_cast %50 : vector<8xf32> to vector<8x1xf32>
    %52 = math.log %51 : vector<8x1xf32>
    %53 = vector.broadcast %52 : vector<8x1xf32> to vector<8x128xf32>
    %54 = arith.subf %48, %53 : vector<8x128xf32>
    %c0_34 = arith.constant 0 : index
    %c0_35 = arith.constant 0 : index
    %55 = vector.load %arg12[%c0_34, %c0_35] : memref<8x128xf32, #tpu.memory_space<vmem>>, vector<8x128xf32>
    tpu.vector_store %arg12[%c0_34, %c0_35], %54 {strides = array<i32>} : memref<8x128xf32, #tpu.memory_space<vmem>>, vector<8x128xf32>,
    return
  }
  func.func @transform_0(%arg0: i32) -> (i32, i32) {
    %c0_i32 = arith.constant 0 : i32
    %c0_i32_0 = arith.constant 0 : i32
    %c0_i32_1 = arith.constant 0 : i32
    return %c0_i32, %c0_i32_0 : i32, i32
  }
  func.func @transform_1(%arg0: i32) -> (i32, i32) {
    %c0_i32 = arith.constant 0 : i32
    %c0_i32_0 = arith.constant 0 : i32
    %c0_i32_1 = arith.constant 0 : i32
    return %c0_i32, %c0_i32_0 : i32, i32
  }
  func.func @transform_2(%arg0: i32) -> (i32, i32) {
    %c0_i32 = arith.constant 0 : i32
    %c0_i32_0 = arith.constant 0 : i32
    %c0_i32_1 = arith.constant 0 : i32
    return %c0_i32, %c0_i32_0 : i32, i32
  }
  func.func @transform_3(%arg0: i32) -> (i32, i32) {
    %c0_i32 = arith.constant 0 : i32
    %c0_i32_0 = arith.constant 0 : i32
    %c0_i32_1 = arith.constant 0 : i32
    return %c0_i32, %c0_i32_0 : i32, i32
  }
  func.func @transform_4(%arg0: i32) -> (i32, i32) {
    %c0_i32 = arith.constant 0 : i32
    %c0_i32_0 = arith.constant 0 : i32
    %c0_i32_1 = arith.constant 0 : i32
    return %c0_i32, %c0_i32_0 : i32, i32
  }
  func.func @transform_5(%arg0: i32) -> (i32, i32) {
    %c0_i32 = arith.constant 0 : i32
    %c0_i32_0 = arith.constant 0 : i32
    %c0_i32_1 = arith.constant 0 : i32
    return %c0_i32, %c0_i32_0 : i32, i32
  }
  func.func @transform_6(%arg0: i32) -> (i32, i32) {
    %c0_i32 = arith.constant 0 : i32
    %c0_i32_0 = arith.constant 0 : i32
    %c0_i32_1 = arith.constant 0 : i32
    return %c0_i32, %c0_i32_0 : i32, i32
  }
  func.func @transform_7(%arg0: i32) -> (i32, i32) {
    %c0_i32 = arith.constant 0 : i32
    %c0_i32_0 = arith.constant 0 : i32
    %c0_i32_1 = arith.constant 0 : i32
    return %c0_i32, %c0_i32_0 : i32, i32
  }
  func.func @transform_8(%arg0: i32) -> (i32, i32) {
    %c0_i32 = arith.constant 0 : i32
    %c0_i32_0 = arith.constant 0 : i32
    %c0_i32_1 = arith.constant 0 : i32
    return %c0_i32, %c0_i32_0 : i32, i32
  }
  func.func @transform_9(%arg0: i32) -> (i32, i32) {
    %c0_i32 = arith.constant 0 : i32
    %c0_i32_0 = arith.constant 0 : i32
    %c0_i32_1 = arith.constant 0 : i32
    return %c0_i32, %c0_i32_0 : i32, i32
  }
  func.func @transform_10(%arg0: i32) -> (i32, i32) {
    %c0_i32 = arith.constant 0 : i32
    %c0_i32_0 = arith.constant 0 : i32
    %c0_i32_1 = arith.constant 0 : i32
    return %c0_i32, %c0_i32_0 : i32, i32
  }
  func.func @transform_11(%arg0: i32) -> (i32, i32) {
    %c0_i32 = arith.constant 0 : i32
    %c0_i32_0 = arith.constant 0 : i32
    %c0_i32_1 = arith.constant 0 : i32
    return %c0_i32, %c0_i32_0 : i32, i32
  }
}

</mosaic_0001>

<bundles_post_ra>
// kernel: graphnet_forward.1
= control target key start
LH: loop header
LB: loop body
LE: loop exit
PB: predicated region body
PF: predicated region fallthrough
CT: control target
= control target key end

     0   :  { %vm1683_vm0 = vmmov 0   ;;  %s1964_s1 = inlined_call_operand.vmem [shape: bf16[128,128], index: 1, kind: input, shape index: {}]   ;;  %s1965_s0 = inlined_call_operand.vmem [shape: bf16[128,128], index: 0, kind: input, shape index: {}]   ;;  %s1966_s2 = inlined_call_operand.vmem [shape: bf16[128,128], index: 2, kind: input, shape index: {}]   ;;  %s1967_s4 = inlined_call_operand.vmem [shape: bf16[128,128], index: 4, kind: input, shape index: {}]   ;;  %s1968_s3 = inlined_call_operand.vmem [shape: f32[1,128], index: 3, kind: input, shape index: {}]   ;;  %s1969_s6 = inlined_call_operand.vmem [shape: bf16[128,128], index: 6, kind: input, shape index: {}]   ;;  %s1970_s5 = inlined_call_operand.vmem [shape: f32[1,128], index: 5, kind: input, shape index: {}]   ;;  %s1971_s9 = inlined_call_operand.vmem [shape: bf16[128,128], index: 9, kind: input, shape index: {}]   ;;  %s1972_s7 = inlined_call_operand.vmem [shape: f32[1,128], index: 7, kind: input, shape index: {}]   ;;  %s1973_s8 = inlined_call_operand.vmem [shape: bf16[8,128], index: 8, kind: input, shape index: {}]   ;;  %s1974_s10 = inlined_call_operand.vmem [shape: f32[1,128], index: 10, kind: input, shape index: {}]   ;;  %s1975_s11 = inlined_call_operand.vmem [shape: f32[8,128], index: 11, kind: output, shape index: {}]  }
   0x1   :  { %v1630_v0 = vld [vmem:[%s1964_s1] sm:$0xff]   ;;  %v1631_v1 = vld [vmem:[%s1964_s1 + $0x8] sm:$0xff]   ;;  %v1632_v2 = vld [vmem:[%s1964_s1 + $0x10] sm:$0xff]  }
   0x2   :  { %1396 = vmatprep.subr.bf16.mxu0 %v1630_v0  ;;  %v1633_v3 = vld [vmem:[%s1964_s1 + $0x18] sm:$0xff]   ;;  %v1759_v4 = vld [vmem:[%s1965_s0] sm:$0xff]   ;;  %v1635_v6 = vld [vmem:[%s1964_s1 + $0x28] sm:$0xff]  }
   0x3   :  { %1397 = vmatpush3.bf16.msra.mxu0 %v1630_v0  ;;  %1412 = vmatprep.mubr.bf16.mxu0 %v1759_v4  ;;  %v1634_v5 = vld [vmem:[%s1964_s1 + $0x20] sm:$0xff]   ;;  %v1647_v8 = vld [vmem:[%s1966_s2 + $0x8] sm:$0xff]   ;;  %v1636_v9 = vld [vmem:[%s1964_s1 + $0x30] sm:$0xff]  }
   0x4   :  { %1398 = vmatprep.subr.bf16.mxu0 %v1631_v1  ;;  %v1646_v7 = vld [vmem:[%s1966_s2] sm:$0xff]   ;;  %v1648_v10 = vld [vmem:[%s1966_s2 + $0x10] sm:$0xff]   ;;  %v1637_v11 = vld [vmem:[%s1964_s1 + $0x38] sm:$0xff]  }
   0x5   :  { %1428 = vmatprep.subr.bf16.mxu1 %v1646_v7  ;;  %v1649_v12 = vld [vmem:[%s1966_s2 + $0x18] sm:$0xff]   ;;  %v1650_v13 = vld [vmem:[%s1966_s2 + $0x20] sm:$0xff]   ;;  %v1792_v14 = vld [vmem:[%s1965_s0 + $0x8] sm:$0xff]  }
   0x6   :  { %1429 = vmatpush3.bf16.msra.mxu1 %v1646_v7  ;;  %v1797_v15 = vld [vmem:[%s1965_s0 + $0x10] sm:$0xff]   ;;  %v1651_v16 = vld [vmem:[%s1966_s2 + $0x28] sm:$0xff]   ;;  %v1810_v18 = vld [vmem:[%s1965_s0 + $0x18] sm:$0xff]  }
   0x7   :  { %1399 = vmatpush3.bf16.msra.mxu0 %v1631_v1  ;;  %1430 = vmatprep.subr.bf16.mxu1 %v1647_v8  ;;  %v1652_v17 = vld [vmem:[%s1966_s2 + $0x30] sm:$0xff]   ;;  %v1815_v19 = vld [vmem:[%s1965_s0 + $0x20] sm:$0xff]   ;;  %v1822_v20 = vld [vmem:[%s1965_s0 + $0x28] sm:$0xff]  }
   0x8   :  { %1400 = vmatprep.subr.bf16.mxu0 %v1632_v2  ;;  %v1827_v21 = vld [vmem:[%s1965_s0 + $0x30] sm:$0xff]   ;;  %v1834_v22 = vld [vmem:[%s1965_s0 + $0x38] sm:$0xff]   ;;  %v1654_v48 = vld [vmem:[%s1967_s4] sm:$0xff]  }
   0x9   :  { %v1653_v23 = vld [vmem:[%s1966_s2 + $0x38] sm:$0xff]   ;;  %v1655_v49 = vld [vmem:[%s1967_s4 + $0x8] sm:$0xff]   ;;  %v1656_v50 = vld [vmem:[%s1967_s4 + $0x10] sm:$0xff]  }
   0xa   :  { %1431 = vmatpush3.bf16.msra.mxu1 %v1647_v8  ;;  %v1657_v51 = vld [vmem:[%s1967_s4 + $0x18] sm:$0xff]   ;;  %v1658_v52 = vld [vmem:[%s1967_s4 + $0x20] sm:$0xff]   ;;  %v1659_v53 = vld [vmem:[%s1967_s4 + $0x28] sm:$0xff]  }
   0xb   :  { %1401 = vmatpush3.bf16.msra.mxu0 %v1632_v2  ;;  %1432 = vmatprep.subr.bf16.mxu1 %v1648_v10  ;;  %v1660_v54 = vld [vmem:[%s1967_s4 + $0x30] sm:$0xff]   ;;  %v1246_v55 = vld [vmem:[%s1968_s3] ss:$0 sm:$0xff] }
   0xc   :  { %1402 = vmatprep.subr.bf16.mxu0 %v1633_v3 }
   0xe   :  { %1433 = vmatpush3.bf16.msra.mxu1 %v1648_v10 }
   0xf   :  { %1403 = vmatpush3.bf16.msra.mxu0 %v1633_v3  ;;  %1434 = vmatprep.subr.bf16.mxu1 %v1649_v12 }
  0x10   :  { %1404 = vmatprep.subr.bf16.mxu0 %v1634_v5 }
  0x12   :  { %1435 = vmatpush3.bf16.msra.mxu1 %v1649_v12 }
  0x13   :  { %1405 = vmatpush3.bf16.msra.mxu0 %v1634_v5  ;;  %1436 = vmatprep.subr.bf16.mxu1 %v1650_v13 }
  0x14   :  { %1406 = vmatprep.subr.bf16.mxu0 %v1635_v6 }
  0x16   :  { %1437 = vmatpush3.bf16.msra.mxu1 %v1650_v13 }
  0x17   :  { %1407 = vmatpush3.bf16.msra.mxu0 %v1635_v6  ;;  %1438 = vmatprep.subr.bf16.mxu1 %v1651_v16 }
  0x18   :  { %1408 = vmatprep.subr.bf16.mxu0 %v1636_v9 }
  0x1a   :  { %1439 = vmatpush3.bf16.msra.mxu1 %v1651_v16 }
  0x1b   :  { %1409 = vmatpush3.bf16.msra.mxu0 %v1636_v9  ;;  %1440 = vmatprep.subr.bf16.mxu1 %v1652_v17 }
  0x1c   :  { %1410 = vmatprep.subr.bf16.mxu0 %v1637_v11 }
  0x1e   :  { %1441 = vmatpush3.bf16.msra.mxu1 %v1652_v17 }
  0x1f   :  { %1411 = vmatpush3.bf16.msra.mxu0 %v1637_v11  ;;  %1442 = vmatprep.subr.bf16.mxu1 %v1653_v23 }
  0x22   :  { %1413 = vmatmul.mubr.bf16.vlgmr.msra.gmra.mrb[0].mxu0 %v1792_v14  ;;  %1443 = vmatpush3.bf16.msra.mxu1 %v1653_v23 }
  0x23   :  { %1416 = vmatprep.mubr.bf16.mxu0 %v1797_v15  ;;  %1492 = vmatprep.subr.bf16.mxu1 %v1654_v48 }
  0x2a   :  { %1417 = vmatmul.mubr.bf16.gmra.mrb[4].mxu0 %v1810_v18 }
  0x2b   :  { %1420 = vmatprep.mubr.bf16.mxu0 %v1815_v19 }
  0x32   :  { %1421 = vmatmul.mubr.bf16.gmra.mrb[8].mxu0 %v1822_v20 }
  0x33   :  { %1424 = vmatprep.mubr.bf16.mxu0 %v1827_v21 }
  0x3a   :  { %1425 = vmatmul.mubr.bf16.gmra.mrb[12].mxu0 %v1834_v22 }
  0x3b   :  { %1476 = vmatprep.mubr.bf16.mxu0 %v1759_v4 }
  0xf5   :  { %v1414_v24 = vpop.f32.mrb[0].mxu0 }
  0xf6   :  { %v201_v25 = vpop.f32.mrb[1].mxu0 }
  0xf7   :  { %v1415_v26 = vpop.f32.mrb[2].mxu0 }
  0xf8   :  { %v265_v27 = vpack.c.bf16 %v1415_v26, %v1414_v24  ;;  %v204_v28 = vpop.f32.mrb[3].mxu0 }
  0xf9   :  { %v264_v29 = vpack.c.bf16 %v204_v28, %v201_v25 }
  0xfb   :  { %1444 = vmatprep.mubr.bf16.mxu1 %v264_v29 }
  0xfc   :  { %1445 = vmatmul.mubr.bf16.vlgmr.msra.gmra.mrb[0].mxu1 %v265_v27 }
  0xfd   :  { %v1418_v30 = vpop.f32.mrb[4].mxu0  ;;  %1493 = vmatpush3.bf16.msra.mxu1 %v1654_v48 }
  0xfe   :  { %v217_v31 = vpop.f32.mrb[5].mxu0  ;;  %1494 = vmatprep.subr.bf16.mxu1 %v1655_v49 }
  0xff   :  { %v1419_v32 = vpop.f32.mrb[6].mxu0 }
 0x100   :  { %v267_v33 = vpack.c.bf16 %v1419_v32, %v1418_v30  ;;  %v220_v34 = vpop.f32.mrb[7].mxu0 }
 0x101   :  { %v266_v35 = vpack.c.bf16 %v220_v34, %v217_v31  ;;  %1495 = vmatpush3.bf16.msra.mxu1 %v1655_v49 }
 0x102   :  { %1496 = vmatprep.subr.bf16.mxu1 %v1656_v50 }
 0x103   :  { %1448 = vmatprep.mubr.bf16.mxu1 %v266_v35 }
 0x104   :  { %1449 = vmatmul.mubr.bf16.gmra.mrb[4].mxu1 %v267_v33 }
 0x105   :  { %v1422_v36 = vpop.f32.mrb[8].mxu0  ;;  %1497 = vmatpush3.bf16.msra.mxu1 %v1656_v50 }
 0x106   :  { %v233_v37 = vpop.f32.mrb[9].mxu0  ;;  %1498 = vmatprep.subr.bf16.mxu1 %v1657_v51 }
 0x107   :  { %v1423_v38 = vpop.f32.mrb[10].mxu0 }
 0x108   :  { %v269_v39 = vpack.c.bf16 %v1423_v38, %v1422_v36  ;;  %v236_v40 = vpop.f32.mrb[11].mxu0 }
 0x109   :  { %v268_v41 = vpack.c.bf16 %v236_v40, %v233_v37  ;;  %1499 = vmatpush3.bf16.msra.mxu1 %v1657_v51 }
 0x10a   :  { %1500 = vmatprep.subr.bf16.mxu1 %v1658_v52 }
 0x10b   :  { %1452 = vmatprep.mubr.bf16.mxu1 %v268_v41 }
 0x10c   :  { %1453 = vmatmul.mubr.bf16.gmra.mrb[8].mxu1 %v269_v39 }
 0x10d   :  { %v1426_v42 = vpop.f32.mrb[12].mxu0  ;;  %1501 = vmatpush3.bf16.msra.mxu1 %v1658_v52 }
 0x10e   :  { %v249_v43 = vpop.f32.mrb[13].mxu0  ;;  %1502 = vmatprep.subr.bf16.mxu1 %v1659_v53 }
 0x10f   :  { %v1427_v44 = vpop.f32.mrb[14].mxu0 }
 0x110   :  { %v271_v45 = vpack.c.bf16 %v1427_v44, %v1426_v42  ;;  %v252_v46 = vpop.f32.mrb[15].mxu0 }
 0x111   :  { %v270_v47 = vpack.c.bf16 %v252_v46, %v249_v43  ;;  %1503 = vmatpush3.bf16.msra.mxu1 %v1659_v53 }
 0x112   :  { %1504 = vmatprep.subr.bf16.mxu1 %v1660_v54 }
 0x113   :  { %1456 = vmatprep.mubr.bf16.mxu1 %v270_v47 }
 0x114   :  { %1457 = vmatmul.mubr.bf16.gmra.mrb[12].mxu1 %v271_v45 }
 0x115   :  { %1505 = vmatpush3.bf16.msra.mxu1 %v1660_v54 }
 0x1cf   :  { %v1446_v56 = vpop.f32.mrb[0].mxu1 }
 0x1d0   :  { %v386_v57 = vadd.f32 %v1446_v56, %v1246_v55  ;;  %v377_v58 = vpop.f32.mrb[1].mxu1 }
 0x1d1   :  { %v378_v59 = vadd.f32 %v1246_v55, %v377_v58  ;;  %v1447_v60 = vpop.f32.mrb[2].mxu1 }
 0x1d2   :  { %v389_v61 = vadd.f32 %v1447_v60, %v1246_v55  ;;  %v380_v62 = vpop.f32.mrb[3].mxu1  ;;  %v442_v0 = vmax.f32 %v386_v57, 0.0 }
 0x1d3   :  { %v381_v63 = vadd.f32 %v1246_v55, %v380_v62  ;;  %v440_v2 = vmax.f32 %v378_v59, 0.0 }
 0x1d4   :  { %v443_v1 = vmax.f32 %v389_v61, 0.0 }
 0x1d5   :  { %v441_v3 = vmax.f32 %v381_v63, 0.0 }
 0x1d6   :  { %v457_v5 = vpack.c.bf16 %v443_v1, %v442_v0 }
 0x1d7   :  { %v456_v6 = vpack.c.bf16 %v441_v3, %v440_v2  ;;  %v1450_v7 = vpop.f32.mrb[4].mxu1 }
 0x1d8   :  { %v402_v8 = vadd.f32 %v1450_v7, %v1246_v55  ;;  %v393_v9 = vpop.f32.mrb[5].mxu1 }
 0x1d9   :  { %v394_v10 = vadd.f32 %v1246_v55, %v393_v9  ;;  %v1451_v11 = vpop.f32.mrb[6].mxu1  ;;  %1460 = vmatprep.subr.bf16.mxu0 %v456_v6 }
 0x1da   :  { %v405_v12 = vadd.f32 %v1451_v11, %v1246_v55  ;;  %v396_v13 = vpop.f32.mrb[7].mxu1  ;;  %1461 = vmatpush3.bf16.msra.mxu0 %v456_v6  ;;  %v446_v17 = vmax.f32 %v402_v8, 0.0 }
 0x1db   :  { %v397_v16 = vadd.f32 %v1246_v55, %v396_v13  ;;  %1462 = vmatprep.subr.bf16.mxu0 %v457_v5  ;;  %v444_v24 = vmax.f32 %v394_v10, 0.0 }
 0x1dc   :  { %v447_v23 = vmax.f32 %v405_v12, 0.0 }
 0x1dd   :  { %v445_v25 = vmax.f32 %v397_v16, 0.0 }
 0x1de   :  { %v459_v26 = vpack.c.bf16 %v447_v23, %v446_v17  ;;  %1463 = vmatpush3.bf16.msra.mxu0 %v457_v5 }
 0x1df   :  { %v458_v27 = vpack.c.bf16 %v445_v25, %v444_v24  ;;  %v1454_v28 = vpop.f32.mrb[8].mxu1  ;;  %v1662_v24 = vld [vmem:[%s1969_s6] sm:$0xff]   ;;  %v1663_v25 = vld [vmem:[%s1969_s6 + $0x8] sm:$0xff]  }
 0x1e0   :  { %v418_v29 = vadd.f32 %v1454_v28, %v1246_v55  ;;  %v409_v30 = vpop.f32.mrb[9].mxu1  ;;  %v1666_v28 = vld [vmem:[%s1969_s6 + $0x20] sm:$0xff]  }
 0x1e1   :  { %v410_v31 = vadd.f32 %v1246_v55, %v409_v30  ;;  %v1455_v32 = vpop.f32.mrb[10].mxu1  ;;  %1464 = vmatprep.subr.bf16.mxu0 %v458_v27  ;;  %v1668_v30 = vld [vmem:[%s1969_s6 + $0x30] sm:$0xff]  }
 0x1e2   :  { %v421_v33 = vadd.f32 %v1455_v32, %v1246_v55  ;;  %v412_v34 = vpop.f32.mrb[11].mxu1  ;;  %1465 = vmatpush3.bf16.msra.mxu0 %v458_v27  ;;  %v450_v36 = vmax.f32 %v418_v29, 0.0  ;;  %v1665_v27 = vld [vmem:[%s1969_s6 + $0x18] sm:$0xff]   ;;  %v1667_v29 = vld [vmem:[%s1969_s6 + $0x28] sm:$0xff]  }
 0x1e3   :  { %v413_v35 = vadd.f32 %v1246_v55, %v412_v34  ;;  %1466 = vmatprep.subr.bf16.mxu0 %v459_v26  ;;  %v448_v38 = vmax.f32 %v410_v31, 0.0  ;;  %v1255_v31 = vld [vmem:[%s1970_s5] ss:$0 sm:$0xff] }
 0x1e4   :  { %v451_v37 = vmax.f32 %v421_v33, 0.0 }
 0x1e5   :  { %v449_v39 = vmax.f32 %v413_v35, 0.0 }
 0x1e6   :  { %v461_v40 = vpack.c.bf16 %v451_v37, %v450_v36  ;;  %1467 = vmatpush3.bf16.msra.mxu0 %v459_v26  ;;  %v1664_v26 = vld [vmem:[%s1969_s6 + $0x10] sm:$0xff]  }
 0x1e7   :  { %v460_v41 = vpack.c.bf16 %v449_v39, %v448_v38  ;;  %v1458_v42 = vpop.f32.mrb[12].mxu1 }
 0x1e8   :  { %v434_v43 = vadd.f32 %v1458_v42, %v1246_v55  ;;  %v425_v44 = vpop.f32.mrb[13].mxu1 }
 0x1e9   :  { %v426_v45 = vadd.f32 %v1246_v55, %v425_v44  ;;  %v1459_v46 = vpop.f32.mrb[14].mxu1  ;;  %1468 = vmatprep.subr.bf16.mxu0 %v460_v41 }
 0x1ea   :  { %v437_v47 = vadd.f32 %v1459_v46, %v1246_v55  ;;  %v428_v48 = vpop.f32.mrb[15].mxu1  ;;  %1469 = vmatpush3.bf16.msra.mxu0 %v460_v41  ;;  %v454_v50 = vmax.f32 %v434_v43, 0.0 }
 0x1eb   :  { %v429_v49 = vadd.f32 %v1246_v55, %v428_v48  ;;  %1470 = vmatprep.subr.bf16.mxu0 %v461_v40  ;;  %v452_v52 = vmax.f32 %v426_v45, 0.0  ;;  %v1661_v55 = vld [vmem:[%s1967_s4 + $0x38] sm:$0xff]  }
 0x1ec   :  { %v455_v51 = vmax.f32 %v437_v47, 0.0  ;;  %1506 = vmatprep.subr.bf16.mxu1 %v1661_v55 }
 0x1ed   :  { %v453_v53 = vmax.f32 %v429_v49, 0.0  ;;  %1507 = vmatpush3.bf16.msra.mxu1 %v1661_v55 }
 0x1ee   :  { %v463_v54 = vpack.c.bf16 %v455_v51, %v454_v50  ;;  %1471 = vmatpush3.bf16.msra.mxu0 %v461_v40  ;;  %1556 = vmatprep.subr.bf16.mxu1 %v1662_v24 }
 0x1ef   :  { %v462_v56 = vpack.c.bf16 %v453_v53, %v452_v52 }
 0x1f1   :  { %1472 = vmatprep.subr.bf16.mxu0 %v462_v56 }
 0x1f2   :  { %1473 = vmatpush3.bf16.msra.mxu0 %v462_v56 }
 0x1f3   :  { %1474 = vmatprep.subr.bf16.mxu0 %v463_v54 }
 0x1f6   :  { %1475 = vmatpush3.bf16.msra.mxu0 %v463_v54 }
 0x1f9   :  { %1477 = vmatmul.mubr.bf16.vlgmr.msra.gmra.mrb[16].mxu0 %v1792_v14 }
 0x1fa   :  { %1480 = vmatprep.mubr.bf16.mxu0 %v1797_v15 }
 0x201   :  { %1481 = vmatmul.mubr.bf16.gmra.mrb[20].mxu0 %v1810_v18 }
 0x202   :  { %1484 = vmatprep.mubr.bf16.mxu0 %v1815_v19 }
 0x209   :  { %1485 = vmatmul.mubr.bf16.gmra.mrb[24].mxu0 %v1822_v20 }
 0x20a   :  { %1488 = vmatprep.mubr.bf16.mxu0 %v1827_v21 }
 0x211   :  { %1489 = vmatmul.mubr.bf16.gmra.mrb[28].mxu0 %v1834_v22 }
 0x212   :  { %1540 = vmatprep.mubr.bf16.mxu0 %v1759_v4 }
 0x2cc   :  { %v1478_v57 = vpop.f32.mrb[16].mxu0 }
 0x2cd   :  { %v498_v58 = vpop.f32.mrb[17].mxu0 }
 0x2ce   :  { %v1479_v59 = vpop.f32.mrb[18].mxu0 }
 0x2cf   :  { %v562_v60 = vpack.c.bf16 %v1479_v59, %v1478_v57  ;;  %v501_v61 = vpop.f32.mrb[19].mxu0 }
 0x2d0   :  { %v561_v62 = vpack.c.bf16 %v501_v61, %v498_v58 }
 0x2d2   :  { %1508 = vmatprep.mubr.bf16.mxu1 %v561_v62 }
 0x2d3   :  { %1509 = vmatmul.mubr.bf16.vlgmr.msra.gmra.mrb[16].mxu1 %v562_v60 }
 0x2d4   :  { %v1482_v63 = vpop.f32.mrb[20].mxu0  ;;  %1557 = vmatpush3.bf16.msra.mxu1 %v1662_v24 }
 0x2d5   :  { %v514_v0 = vpop.f32.mrb[21].mxu0  ;;  %1558 = vmatprep.subr.bf16.mxu1 %v1663_v25 }
 0x2d6   :  { %v1483_v1 = vpop.f32.mrb[22].mxu0 }
 0x2d7   :  { %v564_v2 = vpack.c.bf16 %v1483_v1, %v1482_v63  ;;  %v517_v3 = vpop.f32.mrb[23].mxu0 }
 0x2d8   :  { %v563_v4 = vpack.c.bf16 %v517_v3, %v514_v0  ;;  %1559 = vmatpush3.bf16.msra.mxu1 %v1663_v25 }
 0x2d9   :  { %1560 = vmatprep.subr.bf16.mxu1 %v1664_v26 }
 0x2da   :  { %1512 = vmatprep.mubr.bf16.mxu1 %v563_v4 }
 0x2db   :  { %1513 = vmatmul.mubr.bf16.gmra.mrb[20].mxu1 %v564_v2 }
 0x2dc   :  { %v1486_v5 = vpop.f32.mrb[24].mxu0  ;;  %1561 = vmatpush3.bf16.msra.mxu1 %v1664_v26 }
 0x2dd   :  { %v530_v6 = vpop.f32.mrb[25].mxu0  ;;  %1562 = vmatprep.subr.bf16.mxu1 %v1665_v27 }
 0x2de   :  { %v1487_v7 = vpop.f32.mrb[26].mxu0 }
 0x2df   :  { %v566_v8 = vpack.c.bf16 %v1487_v7, %v1486_v5  ;;  %v533_v9 = vpop.f32.mrb[27].mxu0 }
 0x2e0   :  { %v565_v10 = vpack.c.bf16 %v533_v9, %v530_v6  ;;  %1563 = vmatpush3.bf16.msra.mxu1 %v1665_v27 }
 0x2e1   :  { %1564 = vmatprep.subr.bf16.mxu1 %v1666_v28 }
 0x2e2   :  { %1516 = vmatprep.mubr.bf16.mxu1 %v565_v10 }
 0x2e3   :  { %1517 = vmatmul.mubr.bf16.gmra.mrb[24].mxu1 %v566_v8 }
 0x2e4   :  { %v1490_v11 = vpop.f32.mrb[28].mxu0  ;;  %1565 = vmatpush3.bf16.msra.mxu1 %v1666_v28 }
 0x2e5   :  { %v546_v12 = vpop.f32.mrb[29].mxu0  ;;  %1566 = vmatprep.subr.bf16.mxu1 %v1667_v29 }
 0x2e6   :  { %v1491_v13 = vpop.f32.mrb[30].mxu0 }
 0x2e7   :  { %v568_v16 = vpack.c.bf16 %v1491_v13, %v1490_v11  ;;  %v549_v17 = vpop.f32.mrb[31].mxu0 }
 0x2e8   :  { %v567_v23 = vpack.c.bf16 %v549_v17, %v546_v12  ;;  %1567 = vmatpush3.bf16.msra.mxu1 %v1667_v29 }
 0x2e9   :  { %1568 = vmatprep.subr.bf16.mxu1 %v1668_v30 }
 0x2ea   :  { %1520 = vmatprep.mubr.bf16.mxu1 %v567_v23 }
 0x2eb   :  { %1521 = vmatmul.mubr.bf16.gmra.mrb[28].mxu1 %v568_v16 }
 0x2ec   :  { %1569 = vmatpush3.bf16.msra.mxu1 %v1668_v30 }
 0x3a6   :  { %v1510_v32 = vpop.f32.mrb[16].mxu1 }
 0x3a7   :  { %v683_v33 = vadd.f32 %v1510_v32, %v1255_v31  ;;  %v674_v34 = vpop.f32.mrb[17].mxu1 }
 0x3a8   :  { %v675_v35 = vadd.f32 %v1255_v31, %v674_v34  ;;  %v1511_v36 = vpop.f32.mrb[18].mxu1 }
 0x3a9   :  { %v686_v37 = vadd.f32 %v1511_v36, %v1255_v31  ;;  %v677_v38 = vpop.f32.mrb[19].mxu1  ;;  %v739_v40 = vmax.f32 %v683_v33, 0.0 }
 0x3aa   :  { %v678_v39 = vadd.f32 %v1255_v31, %v677_v38  ;;  %v737_v42 = vmax.f32 %v675_v35, 0.0 }
 0x3ab   :  { %v740_v41 = vmax.f32 %v686_v37, 0.0 }
 0x3ac   :  { %v738_v43 = vmax.f32 %v678_v39, 0.0 }
 0x3ad   :  { %v754_v44 = vpack.c.bf16 %v740_v41, %v739_v40 }
 0x3ae   :  { %v753_v45 = vpack.c.bf16 %v738_v43, %v737_v42  ;;  %v1514_v46 = vpop.f32.mrb[20].mxu1 }
 0x3af   :  { %v699_v47 = vadd.f32 %v1514_v46, %v1255_v31  ;;  %v690_v48 = vpop.f32.mrb[21].mxu1 }
 0x3b0   :  { %v691_v49 = vadd.f32 %v1255_v31, %v690_v48  ;;  %v1515_v50 = vpop.f32.mrb[22].mxu1  ;;  %1524 = vmatprep.subr.bf16.mxu0 %v753_v45 }
 0x3b1   :  { %v702_v51 = vadd.f32 %v1515_v50, %v1255_v31  ;;  %v693_v52 = vpop.f32.mrb[23].mxu1  ;;  %1525 = vmatpush3.bf16.msra.mxu0 %v753_v45  ;;  %v743_v54 = vmax.f32 %v699_v47, 0.0  ;;  %v1670_v50 = vld [vmem:[%s1971_s9] sm:$0xff]  }
 0x3b2   :  { %v694_v53 = vadd.f32 %v1255_v31, %v693_v52  ;;  %1526 = vmatprep.subr.bf16.mxu0 %v754_v44  ;;  %v741_v55 = vmax.f32 %v691_v49, 0.0  ;;  %v1682_v49 = vmov 0.0   ;;  %v1672_v52 = vld [vmem:[%s1971_s9 + $0x10] sm:$0xff]  }
 0x3b3   :  { %v744_v56 = vmax.f32 %v702_v51, 0.0  ;;  %v1671_v51 = vld [vmem:[%s1971_s9 + $0x8] sm:$0xff]  }
 0x3b4   :  { %v742_v57 = vmax.f32 %v694_v53, 0.0  ;;  %v1673_v53 = vld [vmem:[%s1971_s9 + $0x18] sm:$0xff]  }
 0x3b5   :  { %v756_v58 = vpack.c.bf16 %v744_v56, %v743_v54  ;;  %1527 = vmatpush3.bf16.msra.mxu0 %v754_v44  ;;  %v1674_v54 = vld [vmem:[%s1971_s9 + $0x20] sm:$0xff]   ;;  %v1675_v56 = vld [vmem:[%s1971_s9 + $0x28] sm:$0xff]  }
 0x3b6   :  { %v755_v59 = vpack.c.bf16 %v742_v57, %v741_v55  ;;  %v1518_v60 = vpop.f32.mrb[24].mxu1  ;;  %v1676_v55 = vld [vmem:[%s1971_s9 + $0x30] sm:$0xff]   ;;  %v1264_v57 = vld [vmem:[%s1972_s7] ss:$0 sm:$0xff] }
 0x3b7   :  { %v715_v61 = vadd.f32 %v1518_v60, %v1255_v31  ;;  %v706_v62 = vpop.f32.mrb[25].mxu1 }
 0x3b8   :  { %v707_v63 = vadd.f32 %v1255_v31, %v706_v62  ;;  %v1519_v0 = vpop.f32.mrb[26].mxu1  ;;  %1528 = vmatprep.subr.bf16.mxu0 %v755_v59 }
 0x3b9   :  { %v718_v1 = vadd.f32 %v1519_v0, %v1255_v31  ;;  %v709_v2 = vpop.f32.mrb[27].mxu1  ;;  %1529 = vmatpush3.bf16.msra.mxu0 %v755_v59  ;;  %v747_v4 = vmax.f32 %v715_v61, 0.0 }
 0x3ba   :  { %v710_v3 = vadd.f32 %v1255_v31, %v709_v2  ;;  %1530 = vmatprep.subr.bf16.mxu0 %v756_v58  ;;  %v745_v6 = vmax.f32 %v707_v63, 0.0 }
 0x3bb   :  { %v748_v5 = vmax.f32 %v718_v1, 0.0 }
 0x3bc   :  { %v746_v7 = vmax.f32 %v710_v3, 0.0 }
 0x3bd   :  { %v758_v8 = vpack.c.bf16 %v748_v5, %v747_v4  ;;  %1531 = vmatpush3.bf16.msra.mxu0 %v756_v58 }
 0x3be   :  { %v757_v9 = vpack.c.bf16 %v746_v7, %v745_v6  ;;  %v1522_v10 = vpop.f32.mrb[28].mxu1 }
 0x3bf   :  { %v731_v11 = vadd.f32 %v1522_v10, %v1255_v31  ;;  %v722_v12 = vpop.f32.mrb[29].mxu1 }
 0x3c0   :  { %v723_v13 = vadd.f32 %v1255_v31, %v722_v12  ;;  %v1523_v16 = vpop.f32.mrb[30].mxu1  ;;  %1532 = vmatprep.subr.bf16.mxu0 %v757_v9 }
 0x3c1   :  { %v734_v17 = vadd.f32 %v1523_v16, %v1255_v31  ;;  %v725_v23 = vpop.f32.mrb[31].mxu1  ;;  %1533 = vmatpush3.bf16.msra.mxu0 %v757_v9  ;;  %v751_v25 = vmax.f32 %v731_v11, 0.0 }
 0x3c2   :  { %v726_v24 = vadd.f32 %v1255_v31, %v725_v23  ;;  %1534 = vmatprep.subr.bf16.mxu0 %v758_v8  ;;  %v749_v27 = vmax.f32 %v723_v13, 0.0  ;;  %v1669_v31 = vld [vmem:[%s1969_s6 + $0x38] sm:$0xff]  }
 0x3c3   :  { %v752_v26 = vmax.f32 %v734_v17, 0.0  ;;  %1570 = vmatprep.subr.bf16.mxu1 %v1669_v31 }
 0x3c4   :  { %v750_v28 = vmax.f32 %v726_v24, 0.0  ;;  %1571 = vmatpush3.bf16.msra.mxu1 %v1669_v31 }
 0x3c5   :  { %v760_v29 = vpack.c.bf16 %v752_v26, %v751_v25  ;;  %1535 = vmatpush3.bf16.msra.mxu0 %v758_v8  ;;  %1608 = vmatprep.subr.bf16.mxu1 %v1682_v49 }
 0x3c6   :  { %v759_v30 = vpack.c.bf16 %v750_v28, %v749_v27 }
 0x3c8   :  { %1536 = vmatprep.subr.bf16.mxu0 %v759_v30 }
 0x3c9   :  { %1537 = vmatpush3.bf16.msra.mxu0 %v759_v30 }
 0x3ca   :  { %1538 = vmatprep.subr.bf16.mxu0 %v760_v29 }
 0x3cd   :  { %1539 = vmatpush3.bf16.msra.mxu0 %v760_v29 }
 0x3ce   :  { %1588 = vmatprep.subr.bf16.mxu0 %v1682_v49 }
 0x3d0   :  { %1541 = vmatmul.mubr.bf16.vlgmr.msra.gmra.mrb[32].mxu0 %v1792_v14 }
 0x3d1   :  { %1544 = vmatprep.mubr.bf16.mxu0 %v1797_v15 }
 0x3d8   :  { %1545 = vmatmul.mubr.bf16.gmra.mrb[36].mxu0 %v1810_v18 }
 0x3d9   :  { %1548 = vmatprep.mubr.bf16.mxu0 %v1815_v19 }
 0x3e0   :  { %1549 = vmatmul.mubr.bf16.gmra.mrb[40].mxu0 %v1822_v20 }
 0x3e1   :  { %1552 = vmatprep.mubr.bf16.mxu0 %v1827_v21 }
 0x3e8   :  { %1553 = vmatmul.mubr.bf16.gmra.mrb[44].mxu0 %v1834_v22 }
 0x3e9   :  { %1604 = vmatprep.mubr.msk.bf16.mxu0 %vm1683_vm0, %v1682_v49 }
 0x4a3   :  { %v1542_v32 = vpop.f32.mrb[32].mxu0 }
 0x4a4   :  { %v795_v14 = vpop.f32.mrb[33].mxu0 }
 0x4a5   :  { %v1543_v33 = vpop.f32.mrb[34].mxu0 }
 0x4a6   :  { %v859_v15 = vpack.c.bf16 %v1543_v33, %v1542_v32  ;;  %v798_v34 = vpop.f32.mrb[35].mxu0 }
 0x4a7   :  { %v858_v18 = vpack.c.bf16 %v798_v34, %v795_v14 }
 0x4a9   :  { %1572 = vmatprep.mubr.bf16.mxu1 %v858_v18 }
 0x4aa   :  { %1573 = vmatmul.mubr.bf16.vlgmr.msra.gmra.mrb[32].mxu1 %v859_v15 }
 0x4ab   :  { %v1546_v19 = vpop.f32.mrb[36].mxu0  ;;  %1609 = vmatpush3.bf16.msra.mxu1 %v1670_v50 }
 0x4ac   :  { %v811_v20 = vpop.f32.mrb[37].mxu0  ;;  %1610 = vmatprep.subr.bf16.mxu1 %v1682_v49 }
 0x4ad   :  { %v1547_v35 = vpop.f32.mrb[38].mxu0 }
 0x4ae   :  { %v861_v21 = vpack.c.bf16 %v1547_v35, %v1546_v19  ;;  %v814_v36 = vpop.f32.mrb[39].mxu0 }
 0x4af   :  { %v860_v22 = vpack.c.bf16 %v814_v36, %v811_v20  ;;  %1611 = vmatpush3.bf16.msra.mxu1 %v1671_v51  ;;  %v1058_v51 = vld [vmem:[%s1973_s8] sm:$0xf] }
 0x4b0   :  { %1612 = vmatprep.subr.bf16.mxu1 %v1682_v49 }
 0x4b1   :  { %1576 = vmatprep.mubr.bf16.mxu1 %v860_v22 }
 0x4b2   :  { %1577 = vmatmul.mubr.bf16.gmra.mrb[36].mxu1 %v861_v21 }
 0x4b3   :  { %v1550_v37 = vpop.f32.mrb[40].mxu0  ;;  %1613 = vmatpush3.bf16.msra.mxu1 %v1672_v52  ;;  %v1677_v52 = vld [vmem:[%s1971_s9 + $0x38] sm:$0xff]  }
 0x4b4   :  { %v827_v38 = vpop.f32.mrb[41].mxu0  ;;  %1614 = vmatprep.subr.bf16.mxu1 %v1682_v49 }
 0x4b5   :  { %v1551_v39 = vpop.f32.mrb[42].mxu0 }
 0x4b6   :  { %v863_v40 = vpack.c.bf16 %v1551_v39, %v1550_v37  ;;  %v830_v41 = vpop.f32.mrb[43].mxu0 }
 0x4b7   :  { %v862_v42 = vpack.c.bf16 %v830_v41, %v827_v38  ;;  %1615 = vmatpush3.bf16.msra.mxu1 %v1673_v53 }
 0x4b8   :  { %1616 = vmatprep.subr.bf16.mxu1 %v1682_v49 }
 0x4b9   :  { %1580 = vmatprep.mubr.bf16.mxu1 %v862_v42 }
 0x4ba   :  { %1581 = vmatmul.mubr.bf16.gmra.mrb[40].mxu1 %v863_v40 }
 0x4bb   :  { %v1554_v43 = vpop.f32.mrb[44].mxu0  ;;  %1617 = vmatpush3.bf16.msra.mxu1 %v1674_v54 }
 0x4bc   :  { %v843_v44 = vpop.f32.mrb[45].mxu0  ;;  %1618 = vmatprep.subr.bf16.mxu1 %v1682_v49 }
 0x4bd   :  { %v1555_v45 = vpop.f32.mrb[46].mxu0 }
 0x4be   :  { %v865_v46 = vpack.c.bf16 %v1555_v45, %v1554_v43  ;;  %v846_v47 = vpop.f32.mrb[47].mxu0 }
 0x4bf   :  { %v864_v48 = vpack.c.bf16 %v846_v47, %v843_v44  ;;  %1619 = vmatpush3.bf16.msra.mxu1 %v1675_v56 }
 0x4c0   :  { %1620 = vmatprep.subr.bf16.mxu1 %v1682_v49 }
 0x4c1   :  { %1584 = vmatprep.mubr.bf16.mxu1 %v864_v48 }
 0x4c2   :  { %1585 = vmatmul.mubr.bf16.gmra.mrb[44].mxu1 %v865_v46 }
 0x4c3   :  { %1624 = vmatprep.mubr.msk.bf16.mxu1 %vm1683_vm0, %v1682_v49  ;;  %1621 = vmatpush3.bf16.msra.mxu1 %v1676_v55 }
 0x4c4   :  { %1622 = vmatprep.subr.bf16.mxu1 %v1682_v49 }
 0x4c7   :  { %1623 = vmatpush3.bf16.msra.mxu1 %v1677_v52 }
 0x57d   :  { %v1574_v58 = vpop.f32.mrb[32].mxu1 }
 0x57e   :  { %v980_v59 = vadd.f32 %v1574_v58, %v1264_v57  ;;  %v971_v60 = vpop.f32.mrb[33].mxu1  ;;  %v1211_v58 = vlaneseq }
 0x57f   :  { %v972_v61 = vadd.f32 %v1264_v57, %v971_v60  ;;  %v1575_v62 = vpop.f32.mrb[34].mxu1 }
 0x580   :  { %v983_v63 = vadd.f32 %v1575_v62, %v1264_v57  ;;  %v974_v0 = vpop.f32.mrb[35].mxu1  ;;  %v1036_v2 = vmax.f32 %v980_v59, 0.0  ;;  %v1212_v59 = vand.u32 127, %v1211_v58 }
 0x581   :  { %v975_v1 = vadd.f32 %v1264_v57, %v974_v0  ;;  %v1034_v4 = vmax.f32 %v972_v61, 0.0 }
 0x582   :  { %v1037_v3 = vmax.f32 %v983_v63, 0.0  ;;  %vm1213_vm1 = vcmp.lt.s32.totalorder %v1212_v59, 4 }
 0x583   :  { %v1035_v5 = vmax.f32 %v975_v1, 0.0 }
 0x584   :  { %v1051_v6 = vpack.c.bf16 %v1037_v3, %v1036_v2 }
 0x585   :  { %v1050_v7 = vpack.c.bf16 %v1035_v5, %v1034_v4  ;;  %v1578_v8 = vpop.f32.mrb[36].mxu1 }
 0x586   :  { %v996_v9 = vadd.f32 %v1578_v8, %v1264_v57  ;;  %v987_v10 = vpop.f32.mrb[37].mxu1 }
 0x587   :  { %v988_v11 = vadd.f32 %v1264_v57, %v987_v10  ;;  %v1579_v12 = vpop.f32.mrb[38].mxu1  ;;  %1589 = vmatpush3.bf16.msra.mxu0 %v1050_v7 }
 0x588   :  { %v999_v13 = vadd.f32 %v1579_v12, %v1264_v57  ;;  %v990_v16 = vpop.f32.mrb[39].mxu1  ;;  %1590 = vmatprep.subr.bf16.mxu0 %v1682_v49  ;;  %v1040_v23 = vmax.f32 %v996_v9, 0.0 }
 0x589   :  { %v991_v17 = vadd.f32 %v1264_v57, %v990_v16  ;;  %v1038_v25 = vmax.f32 %v988_v11, 0.0 }
 0x58a   :  { %v1041_v24 = vmax.f32 %v999_v13, 0.0 }
 0x58b   :  { %v1039_v26 = vmax.f32 %v991_v17, 0.0  ;;  %1591 = vmatpush3.bf16.msra.mxu0 %v1051_v6 }
 0x58c   :  { %v1053_v27 = vpack.c.bf16 %v1041_v24, %v1040_v23  ;;  %1592 = vmatprep.subr.bf16.mxu0 %v1682_v49 }
 0x58d   :  { %v1052_v28 = vpack.c.bf16 %v1039_v26, %v1038_v25  ;;  %v1582_v29 = vpop.f32.mrb[40].mxu1 }
 0x58e   :  { %v1012_v30 = vadd.f32 %v1582_v29, %v1264_v57  ;;  %v1003_v31 = vpop.f32.mrb[41].mxu1 }
 0x58f   :  { %v1004_v32 = vadd.f32 %v1264_v57, %v1003_v31  ;;  %v1583_v14 = vpop.f32.mrb[42].mxu1  ;;  %1593 = vmatpush3.bf16.msra.mxu0 %v1052_v28 }
 0x590   :  { %v1015_v33 = vadd.f32 %v1583_v14, %v1264_v57  ;;  %v1006_v15 = vpop.f32.mrb[43].mxu1  ;;  %1594 = vmatprep.subr.bf16.mxu0 %v1682_v49  ;;  %v1044_v18 = vmax.f32 %v1012_v30, 0.0 }
 0x591   :  { %v1007_v34 = vadd.f32 %v1264_v57, %v1006_v15  ;;  %v1042_v20 = vmax.f32 %v1004_v32, 0.0 }
 0x592   :  { %v1045_v19 = vmax.f32 %v1015_v33, 0.0 }
 0x593   :  { %v1043_v35 = vmax.f32 %v1007_v34, 0.0  ;;  %1595 = vmatpush3.bf16.msra.mxu0 %v1053_v27 }
 0x594   :  { %v1055_v21 = vpack.c.bf16 %v1045_v19, %v1044_v18  ;;  %1596 = vmatprep.subr.bf16.mxu0 %v1682_v49 }
 0x595   :  { %v1054_v36 = vpack.c.bf16 %v1043_v35, %v1042_v20  ;;  %v1586_v22 = vpop.f32.mrb[44].mxu1 }
 0x596   :  { %v1028_v37 = vadd.f32 %v1586_v22, %v1264_v57  ;;  %v1019_v38 = vpop.f32.mrb[45].mxu1 }
 0x597   :  { %v1020_v39 = vadd.f32 %v1264_v57, %v1019_v38  ;;  %v1587_v40 = vpop.f32.mrb[46].mxu1  ;;  %1597 = vmatpush3.bf16.msra.mxu0 %v1054_v36 }
 0x598   :  { %v1031_v41 = vadd.f32 %v1587_v40, %v1264_v57  ;;  %v1022_v42 = vpop.f32.mrb[47].mxu1  ;;  %1598 = vmatprep.subr.bf16.mxu0 %v1682_v49  ;;  %v1048_v44 = vmax.f32 %v1028_v37, 0.0 }
 0x599   :  { %v1023_v43 = vadd.f32 %v1264_v57, %v1022_v42  ;;  %v1046_v46 = vmax.f32 %v1020_v39, 0.0 }
 0x59a   :  { %v1049_v45 = vmax.f32 %v1031_v41, 0.0 }
 0x59b   :  { %v1047_v47 = vmax.f32 %v1023_v43, 0.0  ;;  %1599 = vmatpush3.bf16.msra.mxu0 %v1055_v21 }
 0x59c   :  { %v1057_v48 = vpack.c.bf16 %v1049_v45, %v1048_v44  ;;  %1600 = vmatprep.subr.bf16.mxu0 %v1682_v49 }
 0x59d   :  { %v1056_v50 = vpack.c.bf16 %v1047_v47, %v1046_v46 }
 0x59f   :  { %1601 = vmatpush3.bf16.msra.mxu0 %v1056_v50 }
 0x5a0   :  { %1602 = vmatprep.subr.bf16.mxu0 %v1682_v49  ;;  %v1273_v49 = vld [vmem:[%s1974_s10] ss:$0 sm:$0xff] }
 0x5a3   :  { %1603 = vmatpush3.bf16.msra.mxu0 %v1057_v48 }
 0x5a6   :  { %1605 = vmatmul.mubr.bf16.vlgmr.msra.gmra.mrb[48].mxu0 %v1058_v51 }
 0x679   :  { %v1093_v53 = vpop.f32.mrb[48].mxu0 }
 0x67a   :  { %v1099_v54 = vpack.c.bf16 %v1093_v53, %v1093_v53  ;;  %v1606_v56 = vpop.f32.mrb[49].mxu0 }
 0x67b   :  { %v1096_v55 = vpop.f32.mrb[50].mxu0 }
 0x67c   :  { %v1607_v57 = vpop.f32.mrb[51].mxu0  ;;  %1625 = vmatmul.mubr.bf16.vlgmr.msra.gmra.mrb[48].mxu1 %v1099_v54 }
 0x74f   :  { %v1205_v60 = vpop.f32.mrb[48].mxu1 }
 0x750   :  { %v1206_v61 = vadd.f32 %v1273_v49, %v1205_v60  ;;  %v1626_v62 = vpop.f32.mrb[49].mxu1 }
 0x751   :  { %v1208_v63 = vpop.f32.mrb[50].mxu1 }
 0x752   :  { %v1627_v0 = vpop.f32.mrb[51].mxu1  ;;  %v1214_v1 = vsel %vm1213_vm1, %v1206_v61, -1e+30 }
 0x753   :  { %1215 = vmax.xlane.f32.xlu0 %v1214_v1 }
 0x7e0   :  { %v1216_v2 = vpop.xlane.xlu0 %1215 }
 0x7e1   :  { %v1217_v3 = vsub.f32 %v1214_v1, %v1216_v2 }
 0x7e3   :  { %v1218_v4 = vmul.f32 1.442695, %v1217_v3 }
 0x7e5   :  { %1678 = vpow2.f32 %v1218_v4 }
 0x7ef   :  { %v1679_v5 = vpop.eup %1678 }
 0x7f0   :  { %1220 = vadd.xlane.f32.xlu0 %v1679_v5 }
 0x87d   :  { %v1221_v6 = vpop.xlane.xlu0 %1220 }
 0x87e   :  { %1680 = vlog2.f32 %v1221_v6 }
 0x888   :  { %v1681_v7 = vpop.eup %1680 }
 0x889   :  { %v1223_v8 = vmul.f32 0.6931472, %v1681_v7 }
 0x88b   :  { %v1224_v9 = vsub.f32 %v1217_v3, %v1223_v8 }
 0x88d   :  { %1225 = vst [vmem:[%s1975_s11] sm:$0xff] %v1224_v9 }

</bundles_post_ra>
